<compile_context>
chip_gen: v5e
topology: v5e:2x2
jax: 0.10.0
libtpu: 0.0.40
codegen_flags: <defaults>
</compile_context>

<pallas_src>
import jax
import jax.numpy as jnp
from jax.experimental import pallas as pl
from jax.experimental.pallas import tpu as pltpu

_SUBLANE = 8
_LANE = 128


def _round_up(x, m):
    return ((x + m - 1) // m) * m


def _round_down(x, m):
    return (x // m) * m


def _vmem_cap_bytes():
    """Generation-aware usable-VMEM budget (~75% of physical per-core VMEM)."""
    phys = 64 * 1024 * 1024            # conservative default: v7x has 64 MiB / TC
    try:
        phys = int(pltpu.get_tpu_info().vmem_capacity_bytes)
    except Exception:
        pass
    return max(3 * phys // 4, 16 * 1024 * 1024)


def _resident_spec(shape, index_map):
    """BlockSpec for a block whose index_map is constant over the whole grid:
    request single buffering (nothing to double-buffer)."""
    if hasattr(pl, "Buffered"):
        try:
            return pl.BlockSpec(shape, index_map, pipeline_mode=pl.Buffered(1))
        except TypeError:
            pass
    return pl.BlockSpec(shape, index_map)


def _plan_tiles(nt, d, h, itemsize, vmem_cap, h_tile=None):
    """Pick (tm, n_row_tiles, th, n_h_tiles) from the VMEM budget."""
    # ---- output-column (H) tiling: only when the weight cannot stay resident.
    if h_tile is not None:
        th = min(int(h_tile), h)       # caller override (multiple of 128 if < h)
    elif d * h * itemsize <= vmem_cap // 3:
        th = h                         # whole weight stays VMEM-resident
    else:
        th = _round_down((vmem_cap // 3) // (d * itemsize), _LANE)
        th = max(th, _LANE)
        # TODO(synk): if even one 128-wide weight column tile overflows VMEM
        # (huge D), also tile the contraction (D) axis with an f32 VMEM
        # accumulator + pl.when init/finalize.
    if th >= h:
        th = h
    n_h = pl.cdiv(h, th)

    # ---- row tile from the remaining VMEM (x / out tiles are double-buffered).
    resident = 2 * itemsize * d * th + 2 * 4 * th     # weight + f32 bias (worst case)
    avail = max(vmem_cap - resident, 2 * 1024 * 1024)
    tm = _round_down(avail // (2 * itemsize * (d + th)), _SUBLANE)
    tm = max(_SUBLANE, min(tm, 8192))
    # v7x: keep >= ~8 row-grid steps so both TensorCores get balanced work
    # (no measurable effect on single-core v5e/v6e).
    tm = min(tm, max(_SUBLANE, _round_up(pl.cdiv(nt, 8), _SUBLANE)))
    if tm >= nt:
        tm = nt                        # single full-extent row block
    n_rows = pl.cdiv(nt, tm)
    return tm, n_rows, th, n_h


def _linear_kernel(x_ref, w_ref, b_ref, o_ref):
    # x_ref: (tm, D) streamed row tile | w_ref: (D, th) resident weight tile
    # b_ref: (1, th) f32 resident bias | o_ref: (tm, th) output tile
    acc = jnp.dot(x_ref[...], w_ref[...], preferred_element_type=jnp.float32)
    o_ref[...] = (acc + b_ref[...]).astype(o_ref.dtype)


def pallas_linear(x2d, weight, bias, *, h_tile=None):
    """y = x2d @ weight.T + bias   (weight in PyTorch nn.Linear (H, D) layout)."""
    nt, d = x2d.shape
    h, d_w = weight.shape
    assert d_w == d
    assert bias.shape == (h,)

    itemsize = jnp.dtype(x2d.dtype).itemsize
    vmem_cap = _vmem_cap_bytes()
    tm, n_rows, th, n_h = _plan_tiles(nt, d, h, itemsize, vmem_cap, h_tile)

    # One-time layout prep (O(H*D) HBM, negligible vs. the NT-scaled streams).
    wt = weight.T                                  # (D, H): canonical MXU layout
    b2 = bias.astype(jnp.float32).reshape(1, h)    # f32 once; no per-step cast

    x_spec = pl.BlockSpec((tm, d), lambda j, i: (i, 0))
    if n_h == 1:                                   # constant index_maps -> single buffer
        w_spec = _resident_spec((d, th), lambda j, i: (0, 0))
        b_spec = _resident_spec((1, th), lambda j, i: (0, 0))
    else:
        w_spec = pl.BlockSpec((d, th), lambda j, i: (0, j))
        b_spec = pl.BlockSpec((1, th), lambda j, i: (0, j))
    out_spec = pl.BlockSpec((tm, th), lambda j, i: (i, j))

    cost = pl.CostEstimate(
        flops=2 * nt * d * h,
        transcendentals=0,
        bytes_accessed=itemsize * (nt * d + nt * h + d * h) + 4 * h,
    )

    return pl.pallas_call(
        _linear_kernel,
        out_shape=jax.ShapeDtypeStruct((nt, h), x2d.dtype),
        grid_spec=pltpu.PrefetchScalarGridSpec(
            num_scalar_prefetch=0,
            grid=(n_h, n_rows),        # rows innermost: weight col-tile stays put
            in_specs=[x_spec, w_spec, b_spec],
            out_specs=out_spec,
        ),
        compiler_params=pltpu.CompilerParams(
            dimension_semantics=("parallel", "parallel"),
            vmem_limit_bytes=int(vmem_cap),
        ),
        cost_estimate=cost,
    )(x2d, wt, b2)


def sequence_wise_forward(x, weight, bias, *, h_tile=None):
    """Exact SequenceWise.forward semantics around a Linear module."""
    dim = x.ndim
    n = t = 0
    if dim > 2:
        n, t = x.shape[0], x.shape[1]
        x = x.reshape(n * t, -1)                           # view(n*t, -1)
    y = pallas_linear(x, weight, bias, h_tile=h_tile)      # self.module(x)
    if dim > 2:
        y = y.reshape(t, n, -1)                            # view(t, n, -1) (raw reshape)
    return y


if __name__ == "__main__":
    key = jax.random.PRNGKey(0)

    def torch_linear_init(kw, kb, h, d):
        bound = 1.0 / (d ** 0.5)   # PyTorch nn.Linear init: U(-1/sqrt(D), 1/sqrt(D))
        w = jax.random.uniform(kw, (h, d), jnp.float32, -bound, bound)
        b = jax.random.uniform(kb, (h,), jnp.float32, -bound, bound)
        return w, b

    # ---- Case 1: canonical small shapes (N=2, T=8, D=32, H=32) ----
    N, T, D, H = 2, 8, 32, 32
    kx, kw, kb, key = jax.random.split(key, 4)
    x = jax.random.normal(kx, (N, T, D), dtype=jnp.float32)
    weight, bias = torch_linear_init(kw, kb, H, D)
    out = jax.block_until_ready(sequence_wise_forward(x, weight, bias))
    ref = (x.reshape(N * T, D) @ weight.T + bias).reshape(T, N, H)
    assert out.shape == (T, N, H)
    assert jnp.allclose(out, ref, atol=1e-5, rtol=1e-5)

    # ---- Case 2: ragged last row block (NT = 210, not a multiple of tm) ----
    N2, T2 = 3, 70
    kx2, key = jax.random.split(key)
    x2 = jax.random.normal(kx2, (N2, T2, D), dtype=jnp.float32)
    out2 = jax.block_until_ready(sequence_wise_forward(x2, weight, bias))
    ref2 = (x2.reshape(N2 * T2, D) @ weight.T + bias).reshape(T2, N2, H)
    assert out2.shape == (T2, N2, H)
    assert jnp.allclose(out2, ref2, atol=1e-5, rtol=1e-5)

    # ---- Case 3: dim <= 2 input (module applies the Linear directly) ----
    kx3, key = jax.random.split(key)
    x3 = jax.random.normal(kx3, (5, D), dtype=jnp.float32)
    out3 = jax.block_until_ready(sequence_wise_forward(x3, weight, bias))
    ref3 = x3 @ weight.T + bias
    assert out3.shape == (5, H)
    assert jnp.allclose(out3, ref3, atol=1e-5, rtol=1e-5)

    # ---- Case 4: exercise the H-tiled (large-weight) path at small shapes ----
    H4 = 224                               # ragged last H block (128 + 96 lanes)
    kw4, kb4, kx4, key = jax.random.split(key, 4)
    w4, b4 = torch_linear_init(kw4, kb4, H4, D)
    x4 = jax.random.normal(kx4, (2, 8, D), dtype=jnp.float32)
    out4 = jax.block_until_ready(sequence_wise_forward(x4, w4, b4, h_tile=128))
    ref4 = (x4.reshape(16, D) @ w4.T + b4).reshape(8, 2, H4)
    assert out4.shape == (8, 2, H4)
    assert jnp.allclose(out4, ref4, atol=1e-5, rtol=1e-5)

    print("KERNEL_OK")
</pallas_src>

<mosaic_0001>
module attributes {stable_mosaic.version = 11 : i64} {
  func.func @_linear_kernel(%arg0: i32, %arg1: i32, %arg2: memref<8x32xf32, #tpu.memory_space<vmem>>, %arg3: memref<32x32xf32, #tpu.memory_space<vmem>>, %arg4: memref<1x32xf32, #tpu.memory_space<vmem>>, %arg5: memref<8x32xf32, #tpu.memory_space<vmem>>) attributes {dimension_semantics = [#tpu.dimension_semantics<parallel>, #tpu.dimension_semantics<parallel>], iteration_bounds = array<i64: 1, 2>, scalar_prefetch = 0 : i64, scratch_operands = 0 : i64, tpu.core_type = #tpu.core_type<tc>, window_params = [{transform_indices = @transform_0, window_bounds = array<i64: 8, 32>}, {pipeline_mode = #tpu.pipeline_mode<synchronous>, transform_indices = @transform_1, window_bounds = array<i64: 32, 32>}, {pipeline_mode = #tpu.pipeline_mode<synchronous>, transform_indices = @transform_2, window_bounds = array<i64: 1, 32>}, {transform_indices = @transform_3, window_bounds = array<i64: 8, 32>}]} {
    %c0 = arith.constant 0 : index
    %c0_0 = arith.constant 0 : index
    %0 = vector.load %arg2[%c0, %c0_0] : memref<8x32xf32, #tpu.memory_space<vmem>>, vector<8x32xf32>
    %c0_1 = arith.constant 0 : index
    %c0_2 = arith.constant 0 : index
    %1 = vector.load %arg3[%c0_1, %c0_2] : memref<32x32xf32, #tpu.memory_space<vmem>>, vector<32x32xf32>
    %cst = arith.constant dense<0.000000e+00> : vector<8x32xf32>
    %2 = tpu.matmul %0, %1, %cst {dimension_numbers = #tpu.dot_dimension_numbers<[1], [0], [0], [1], [0, 0, 1, 1], [], []>} : vector<8x32xf32>, vector<32x32xf32>, vector<8x32xf32> -> vector<8x32xf32>
    %c0_3 = arith.constant 0 : index
    %c0_4 = arith.constant 0 : index
    %3 = vector.load %arg4[%c0_3, %c0_4] : memref<1x32xf32, #tpu.memory_space<vmem>>, vector<1x32xf32>
    %4 = vector.broadcast %3 : vector<1x32xf32> to vector<8x32xf32>
    %5 = arith.addf %2, %4 : vector<8x32xf32>
    %c0_5 = arith.constant 0 : index
    %c0_6 = arith.constant 0 : index
    %6 = vector.load %arg5[%c0_5, %c0_6] : memref<8x32xf32, #tpu.memory_space<vmem>>, vector<8x32xf32>
    tpu.vector_store %arg5[%c0_5, %c0_6], %5 {strides = array<i32>} : memref<8x32xf32, #tpu.memory_space<vmem>>, vector<8x32xf32>,
    return
  }
  func.func @transform_0(%arg0: i32, %arg1: i32) -> (i32, i32) {
    %c0_i32 = arith.constant 0 : i32
    %c0_i32_0 = arith.constant 0 : i32
    return %arg1, %c0_i32 : i32, i32
  }
  func.func @transform_1(%arg0: i32, %arg1: i32) -> (i32, i32) {
    %c0_i32 = arith.constant 0 : i32
    %c0_i32_0 = arith.constant 0 : i32
    %c0_i32_1 = arith.constant 0 : i32
    return %c0_i32, %c0_i32_0 : i32, i32
  }
  func.func @transform_2(%arg0: i32, %arg1: i32) -> (i32, i32) {
    %c0_i32 = arith.constant 0 : i32
    %c0_i32_0 = arith.constant 0 : i32
    %c0_i32_1 = arith.constant 0 : i32
    return %c0_i32, %c0_i32_0 : i32, i32
  }
  func.func @transform_3(%arg0: i32, %arg1: i32) -> (i32, i32) {
    %c0_i32 = arith.constant 0 : i32
    return %arg1, %arg0 : i32, i32
  }
}

</mosaic_0001>

<bundles_post_ra>
// kernel: tpu_custom_call.1
= control target key start
LH: loop header
LB: loop body
LE: loop exit
PB: predicated region body
PF: predicated region fallthrough
CT: control target
= control target key end

     0   :  { %8 = vsyncpa [#allocation3], 0  ;;  %s768_s0 = inlined_call_operand.hbm [shape: f32[16,32], index: 0, kind: input, shape index: {}]   ;;  %s769_s1 = inlined_call_operand.hbm [shape: f32[32,32], index: 1, kind: input, shape index: {}]   ;;  %s770_s2 = inlined_call_operand.vmem [shape: f32[1,32], index: 2, kind: input, shape index: {}]   ;;  %s771_s3 = inlined_call_operand.hbm [shape: f32[16,32], index: 3, kind: output, shape index: {}]  }
   0x1   :  { %10 = vsyncpa [#allocation3 + $0x1], 0 }
   0x2   :  { %11 = vsyncpa [#allocation6], 0 }
   0x3   :  { %12 = vsyncpa [#allocation4], 0 }
   0x4   :  { %14 = vsyncpa [#allocation4 + $0x1], 0  ;;  %s622_s12 = smov 0   ;;  %s624_s13 = smov 0  }
   0x5   :  { %s626_s14 = smov 0   ;;  %s628_s15 = smov 0  }
   0x6   :  { %s630_s16 = smov 0   ;;  %s632_s17 = smov 0  }
   0x7 LB: > { %s359_s18 = sadd.s32 4294967295, %s597_s17   ;;  %p361_p0 = scmp.ge.s32.totalorder %s597_s17, 1  ;;  %s597_s17 = sphi %s632_s17, %s20_s17   ;;  %s593_s16 = sphi %s630_s16, %s782_s16   ;;  %s589_s15 = sphi %s628_s15, %s781_s15   ;;  %s585_s14 = sphi %s626_s14, %s780_s14   ;;  %s581_s13 = sphi %s624_s13, %s779_s13   ;;  %s577_s12 = sphi %s622_s12, %s778_s12  }
   0x8   : > { %p654_p1 = scmp.eq.s32.totalorder %s359_s18, 0  ;;  %p133_p2 = scmp.lt.s32.totalorder %s597_s17, 3 }
   0x9   : > { %s144_s22 = sshll.u32 %s769_s1, 4  ;;  %s599_s24 = smov [#allocation5]   ;;  %s145_s22 = int_to_ptr.hbm [resolvable:$true] %s144_s22 }
   0xa   : > { %p662_p3 = pnand %p361_p0, %p133_p2  ;;  %s146_s25 = sshll.u32 %s599_s24, 4  ;;  %s147_s25 = int_to_ptr.vmem [resolvable:$true] %s146_s25 }
   0xb   : > { %p363_p6 = scmp.ge.s32.totalorder %s597_s17, 2  ;;  %s600_s26 = smov 128  }
   0xc   : > { %p383_p4 = pneg %p662_p3  ;;  %s601_s27 = smov 8  }
   0xd   : > { %s360_s28 = sadd.s32 4294967294, %s597_s17   ;;  %s29_s29 = sadd.s32 1, %s593_s16 }
   0xe   : > { %p384_p5 = pnand %p383_p4, %p654_p1  ;;  %s39_s30 = sadd.s32 1, %s585_s14 }
   0xf   : > { %p30_p7 = scmp.ge.s32.totalorder %s29_s29, 2  ;;  %p46_p8 = scmp.ne.s32.totalorder %s585_s14, %s581_s13 }
  0x10   : > { %386 = dma.hbm_to_vmem [thread:$0]  (!%p384_p5), %s145_s22, 512, %s147_s25, [#allocation6], %s600_s26, %s600_s26, %s601_s27  }
  0x11   : > { %p47_p9 = scmp.eq.s32.totalorder %s597_s17, 0  ;;  %p52_p10 = scmp.ne.s32.totalorder %s581_s13, %s577_s12 }
  0x12   : > { %s784_s29 = smov (%p30_p7, %s29_s29), 0  ;;  %p120_p13 = scmp.eq.s32.totalorder %s359_s18, 1 }
  0x13   : > { %p681_p11 = por %p47_p9, %p46_p8  ;;  %p687_p12 = por %p654_p1, %p52_p10 }
  0x14   : > { %s36_s6 = ssub.s32 %s593_s16, %s784_s29  ;;  %p126_p2 = scmp.eq.s32.totalorder %s360_s28, 1 }
  0x15   : > { %p37_p0 = scmp.eq.s32.totalorder %s36_s6, 0  ;;  %p693_p4 = por %p120_p13, %p46_p8 }
  0x16   : > { %p396_p5 = scmp.lt.s32.totalorder %s597_s17, 2  ;;  %p701_p7 = por %p126_p2, %p52_p10 }
  0x17   : > { %s699_s8 = scalar_select %p37_p0, %s585_s14, %s39_s30  }
  0x18   : > { %s163_s10 = sand.u32 1, %s585_s14   ;;  %s365_s20 = sshll.u32 %s593_s16, 3 }
  0x19   : > { %s364_s11 = sshll.u32 %s163_s10, 3  ;;  %s171_s18 = scalar_lea.hbm %s768_s0, %s365_s20 }
  0x1a   : > { %s167_s24 = scalar_lea.vmem [#allocation2], %s364_s11  ;;  %s173_s26 = sshll.u32 %s171_s18, 4  ;;  %s174_s26 = int_to_ptr.hbm [resolvable:$true] %s173_s26 }
  0x1b   : > { %s175_s25 = sshll.u32 %s167_s24, 4  ;;  %p388_p8 = pnand %p396_p5, %p681_p11  ;;  %s176_s25 = int_to_ptr.vmem [resolvable:$true] %s175_s25 }
  0x1c   : > { %s164_s27 = scalar_lea.sflag [#allocation3], %s163_s10  ;;  %184 = sbr.rel (%p662_p3) target bundleno = 175 (0xaf), region = 32 }
  0x1d   : > { %390 = dma.hbm_to_vmem [thread:$0]  (!%p388_p8), %s174_s26, 128, %s176_s25, %s164_s27  }
  0x1e   : > { %s715_s28 = sand.u32 (!%p662_p3), 1, %s581_s13  }
  0x1f   : > { %s367_s30 = sshll.u32 (!%p662_p3), %s715_s28, 3  ;;  %s187_s6 = scalar_lea.sflag (!%p662_p3), [#allocation3], %s715_s28 }
  0x20   : > { %s190_s11 = scalar_lea.vmem (!%p662_p3), [#allocation2], %s367_s30 }
  0x21   : > { %564 = dma.done.wait (%p687_p12), %s187_s6, 128  }
  0x22   : > { %566 = vsyncadd (%p687_p12), %s187_s6, 4294967168 }
  0x23   : > { %568 = dma.done.wait (%p654_p1), [#allocation6], 512  }
  0x24   : > { %570 = vsyncadd (%p654_p1), [#allocation6], 4294966784  ;;  %v223_v0 = vld [vmem:[#allocation5 + $0x18] sm:$0xff]  ;;  %v222_v1 = vld [vmem:[#allocation5 + $0x10] sm:$0xff]  ;;  %vm228_vm0 = vcmask 261120   ;;  %s372_s23 = sshll.u32 %s589_s15, 3 }
  0x25   : > { %244 = vmatpush.msra.mxu0 %v223_v0  ;;  %v221_v2 = vld [vmem:[#allocation5 + $0x8] sm:$0xff]  ;;  %v220_v3 = vld [vmem:[#allocation5] sm:$0xff]  ;;  %v219_v4 = vld [vmem:[%s190_s11] sm:$0xff]  ;;  %s265_s19 = scalar_lea.hbm %s771_s3, %s372_s23  ;;  %s218_s21 = scalar_lea.vmem [#allocation7], %s367_s30 }
  0x26   : > { %v450_v5 = vld [vmem:[%s770_s2] ss:$0 sm:$0xff]  ;;  %s267_s22 = sshll.u32 %s218_s21, 4  ;;  %s269_s18 = sshll.u32 %s265_s19, 4  ;;  %s268_s22 = int_to_ptr.vmem [resolvable:$true] %s267_s22  ;;  %s270_s18 = int_to_ptr.hbm [resolvable:$true] %s269_s18 }
  0x27   : > { %245 = vmatpush.msra.mxu0 %v222_v1  ;;  %s254_s24 = scalar_lea.sflag [#allocation4], %s715_s28  ;;  %s525_s25 = sshra.s32 %s270_s18, 4  ;;  %s526_s25 = int_to_ptr.hbm [resolvable:$true] %s525_s25 }
  0x28   : > { %s527_s15 = scalar_lea.hbm %s526_s25, 8  ;;  %s531_s6 = scalar_lea.hbm %s771_s3, 16 }
  0x29   : > { %246 = vmatpush.msra.mxu0 %v221_v2  ;;  %p528_p1 = scmp.ne.s32.totalorder %s526_s25, %s527_s15  ;;  %p532_p10 = scmp.lt.s32.totalorder %s526_s25, %s771_s3 }
  0x2a   : > { %p533_p11 = scmp.lt.s32.totalorder %s531_s6, %s527_s15 }
  0x2b   : > { %247 = vmatpush.msra.mxu0 %v220_v3  ;;  %p529_p3 = pnand %p528_p1, %p693_p4 }
  0x2c   : > { %370 = vmatmul.msk.f32.vlgmr.msra.gmra.mxu0 %vm228_vm0, %v219_v4  ;;  %p534_p12 = por %p533_p11, %p532_p10 }
  0x2d   : > { %p530_p9 = pneg %p529_p3 }
  0x2f   : > { %p535_p13 = pnand %p534_p12, %p530_p9 }
  0xa9   : > { %v249_v6 = vpop.f32.mrf.mxu0 }
  0xaa   : > { %v250_v7 = vadd.f32 %v450_v5, %v249_v6 }
  0xac   : > { %252 = vst.msk [vmem:[%s218_s21] sm:$0xff] %vm228_vm0, %v250_v7 }
  0xad   : > { %538 = shalt.err (!%p535_p13)
}
  0xae   : > { %381 = dma.vmem_to_hbm [thread:$0]  (%p693_p4), %s268_s22, 128, %s270_s18, %s254_s24  }
  0xaf PF: > { %s281_s28 = sand.u32 1, %s577_s12   ;;  %p392_p0 = pnand %p363_p6, %p701_p7 }
  0xb0   : > { %s282_s23 = scalar_lea.sflag [#allocation4], %s281_s28 }
  0xb1   : > { %p393_p2 = pneg %p392_p0 }
  0xb3   : > { %572 = dma.done.wait (%p393_p2), %s282_s23, 128  }
  0xb4   : > { %574 = vsyncadd (%p393_p2), %s282_s23, 4294967168  ;;  %s20_s17 = sadd.s32 1, %s597_s17   ;;  %s778_s12 = smov %s581_s13 }
  0xb5   : > { %p17_p5 = scmp.ge.s32.totalorder %s20_s17, 4   ;;  %s779_s13 = smov %s585_s14 }
  0xb6   : > { %s780_s14 = smov %s699_s8  ;;  %s781_s15 = smov %s593_s16 }
  0xb7   : > { %s782_s16 = smov %s784_s29  ;;  %19 = sbr.rel (!%p17_p5) target bundleno = 7 (0x7), region = 81 }
  0xbc   :  { %288 = vsyncpa [#allocation3], 1 }
  0xbd   :  { %290 = vsyncpa [#allocation3 + $0x1], 1 }
  0xbe   :  { %291 = vsyncpa [#allocation6], 1 }
  0xbf   :  { %292 = vsyncpa [#allocation4], 1 }
  0xc0   :  { %294 = vsyncpa [#allocation4 + $0x1], 1 }

</bundles_post_ra>
